<compile_context>
chip_gen: v5e
topology: v5e:2x2
jax: 0.10.0
libtpu: 0.0.40
codegen_flags: <defaults>
</compile_context>

<pallas_src>
import jax
import jax.numpy as jnp
from jax.experimental import pallas as pl
from jax.experimental.pallas import tpu as pltpu

IN_FEATURES = 5
HIDDEN = 256
LANE = 128


def _mlp_kernel(xT_ref, w1T_ref, b1_ref, woT_ref, bo_ref, oT_ref):
    # xT:(5,TM)  w1T:(256,5)  b1:(256,1)  woT:(1,256)  bo:(1,1) in SMEM  oT:(1,TM)
    xT = xT_ref[...]
    h = jnp.dot(w1T_ref[...], xT, preferred_element_type=jnp.float32) + b1_ref[...]
    # LeakyReLU(negative_slope=0.1)
    h = jnp.where(h > 0, h, 0.1 * h)
    y = jnp.dot(woT_ref[...], h, preferred_element_type=jnp.float32) + bo_ref[0, 0]
    # sigmoid: exp + approx reciprocal both run on the EUP slot
    oT_ref[...] = pl.reciprocal(1.0 + jnp.exp(-y), approx=True)


def _round_up(a, b):
    return (a + b - 1) // b * b


def nn_forward(x, w1T, b1, woT, bo, *, tm=4096):
    """x: (B, 5) float32 -> (B, 1) float32."""
    B = x.shape[0]
    # Batch lives on the lane axis; tiles must be multiples of 128 lanes.
    tm = min(_round_up(tm, LANE), _round_up(B, LANE))
    Bp = _round_up(B, tm)

    xT = jnp.transpose(x)  # (5, B), batch -> lanes
    if Bp != B:
        xT = jnp.pad(xT, ((0, 0), (0, Bp - B)))  # pad tail; extra cols discarded later

    grid = (Bp // tm,)

    oT = pl.pallas_call(
        _mlp_kernel,
        out_shape=jax.ShapeDtypeStruct((1, Bp), jnp.float32),
        grid_spec=pltpu.PrefetchScalarGridSpec(
            num_scalar_prefetch=0,
            grid=grid,
            in_specs=[
                # pipelined x tile: (5, TM), lane-dense
                pl.BlockSpec((IN_FEATURES, tm), lambda i: (0, i)),
                # weights / hidden bias stay resident across the batch grid
                pl.BlockSpec((HIDDEN, IN_FEATURES), lambda i: (0, 0)),
                pl.BlockSpec((HIDDEN, 1), lambda i: (0, 0)),
                pl.BlockSpec((1, HIDDEN), lambda i: (0, 0)),
                # output bias: single scalar, keep it in SMEM (no VMEM tile/DMA)
                pl.BlockSpec(memory_space=pltpu.MemorySpace.SMEM),
            ],
            out_specs=pl.BlockSpec((1, tm), lambda i: (0, i)),
        ),
        compiler_params=pltpu.CompilerParams(
            # batch axis is independent -> megacore-shardable on v7x
            dimension_semantics=("parallel",),
        ),
    )(xT, w1T, b1, woT, bo)

    return jnp.transpose(oT[:, :B])  # (B, 1)


def init_params(key):
    """Deterministic init mimicking nn.Linear: U(-1/sqrt(fan_in), 1/sqrt(fan_in)).

    Parameters are stored pre-transposed for the batch-on-lanes kernel layout:
      w1T: (256, 5)   b1: (256, 1)   woT: (1, 256)   bo: (1, 1)
    """
    k1, k2, k3, k4 = jax.random.split(key, 4)
    lim1 = 1.0 / jnp.sqrt(jnp.float32(IN_FEATURES))
    limo = 1.0 / jnp.sqrt(jnp.float32(HIDDEN))
    w1T = jax.random.uniform(k1, (HIDDEN, IN_FEATURES), jnp.float32, -lim1, lim1)
    b1 = jax.random.uniform(k2, (HIDDEN, 1), jnp.float32, -lim1, lim1)
    woT = jax.random.uniform(k3, (1, HIDDEN), jnp.float32, -limo, limo)
    bo = jax.random.uniform(k4, (1, 1), jnp.float32, -limo, limo)
    return w1T, b1, woT, bo


def reference_forward(x, w1T, b1, woT, bo):
    h = x @ w1T.T + b1[:, 0]
    h = jnp.where(h > 0, h, 0.1 * h)
    y = h @ woT.T + bo[0, 0]
    return jax.nn.sigmoid(y)


if __name__ == "__main__":
    key = jax.random.PRNGKey(0)
    kx, kp = jax.random.split(key)
    batch = 8
    x = jax.random.normal(kx, (batch, IN_FEATURES), jnp.float32)
    w1T, b1, woT, bo = init_params(kp)

    out = jax.block_until_ready(nn_forward(x, w1T, b1, woT, bo))
    ref = reference_forward(x, w1T, b1, woT, bo)

    assert out.shape == (batch, 1), out.shape
    # slightly relaxed tolerance: sigmoid uses the EUP approx reciprocal
    assert jnp.allclose(out, ref, atol=1e-3, rtol=1e-3), (out, ref)

    print("KERNEL_OK")
</pallas_src>

<mosaic_0001>
module attributes {stable_mosaic.version = 11 : i64} {
  func.func @_mlp_kernel(%arg0: i32, %arg1: memref<5x128xf32, #tpu.memory_space<vmem>>, %arg2: memref<256x5xf32, #tpu.memory_space<vmem>>, %arg3: memref<256x1xf32, #tpu.memory_space<vmem>>, %arg4: memref<1x256xf32, #tpu.memory_space<vmem>>, %arg5: memref<1x1xf32, #tpu.memory_space<smem>>, %arg6: memref<1x128xf32, #tpu.memory_space<vmem>>) attributes {dimension_semantics = [#tpu.dimension_semantics<parallel>], iteration_bounds = array<i64: 1>, scalar_prefetch = 0 : i64, scratch_operands = 0 : i64, tpu.core_type = #tpu.core_type<tc>, window_params = [{transform_indices = @transform_0, window_bounds = array<i64: 5, 128>}, {pipeline_mode = #tpu.pipeline_mode<synchronous>, transform_indices = @transform_1, window_bounds = array<i64: 256, 5>}, {pipeline_mode = #tpu.pipeline_mode<synchronous>, transform_indices = @transform_2, window_bounds = array<i64: 256, 1>}, {pipeline_mode = #tpu.pipeline_mode<synchronous>, transform_indices = @transform_3, window_bounds = array<i64: 1, 256>}, {transform_indices = @transform_4, window_bounds = array<i64: 1, 1>}, {transform_indices = @transform_5, window_bounds = array<i64: 1, 128>}]} {
    %c0 = arith.constant 0 : index
    %c0_0 = arith.constant 0 : index
    %0 = vector.load %arg1[%c0, %c0_0] : memref<5x128xf32, #tpu.memory_space<vmem>>, vector<5x128xf32>
    %c0_1 = arith.constant 0 : index
    %c0_2 = arith.constant 0 : index
    %1 = vector.load %arg2[%c0_1, %c0_2] : memref<256x5xf32, #tpu.memory_space<vmem>>, vector<256x5xf32>
    %cst = arith.constant dense<0.000000e+00> : vector<256x128xf32>
    %2 = tpu.matmul %1, %0, %cst {dimension_numbers = #tpu.dot_dimension_numbers<[1], [0], [0], [1], [0, 0, 1, 1], [], []>} : vector<256x5xf32>, vector<5x128xf32>, vector<256x128xf32> -> vector<256x128xf32>
    %c0_3 = arith.constant 0 : index
    %c0_4 = arith.constant 0 : index
    %3 = vector.load %arg3[%c0_3, %c0_4] : memref<256x1xf32, #tpu.memory_space<vmem>>, vector<256x1xf32>
    %4 = vector.broadcast %3 : vector<256x1xf32> to vector<256x128xf32>
    %5 = arith.addf %2, %4 : vector<256x128xf32>
    %cst_5 = arith.constant 0.000000e+00 : f32
    %6 = vector.broadcast %cst_5 : f32 to vector<256x128xf32>
    %7 = arith.cmpf ogt, %5, %6 : vector<256x128xf32>
    %cst_6 = arith.constant 1.000000e-01 : f32
    %8 = vector.broadcast %cst_6 : f32 to vector<256x128xf32>
    %9 = arith.mulf %8, %5 : vector<256x128xf32>
    %10 = arith.select %7, %5, %9 : vector<256x128xi1>, vector<256x128xf32>
    %c0_7 = arith.constant 0 : index
    %c0_8 = arith.constant 0 : index
    %11 = vector.load %arg4[%c0_7, %c0_8] : memref<1x256xf32, #tpu.memory_space<vmem>>, vector<1x256xf32>
    %cst_9 = arith.constant dense<0.000000e+00> : vector<1x128xf32>
    %12 = tpu.matmul %11, %10, %cst_9 {dimension_numbers = #tpu.dot_dimension_numbers<[1], [0], [0], [1], [0, 0, 1, 1], [], []>} : vector<1x256xf32>, vector<256x128xf32>, vector<1x128xf32> -> vector<1x128xf32>
    %c0_10 = arith.constant 0 : index
    %c0_11 = arith.constant 0 : index
    %13 = memref.load %arg5[%c0_10, %c0_11] : memref<1x1xf32, #tpu.memory_space<smem>>
    %14 = vector.broadcast %13 : f32 to vector<1x128xf32>
    %15 = arith.addf %12, %14 : vector<1x128xf32>
    %cst_12 = arith.constant 0.000000e+00 : f32
    %16 = vector.broadcast %cst_12 : f32 to vector<1x128xf32>
    %17 = arith.subf %16, %15 : vector<1x128xf32>
    %18 = math.exp %17 : vector<1x128xf32>
    %cst_13 = arith.constant 1.000000e+00 : f32
    %19 = vector.broadcast %cst_13 : f32 to vector<1x128xf32>
    %20 = arith.addf %19, %18 : vector<1x128xf32>
    %21 = tpu.reciprocal %20 {approx = true} : vector<1x128xf32> -> vector<1x128xf32>
    %c0_14 = arith.constant 0 : index
    %c0_15 = arith.constant 0 : index
    %22 = vector.load %arg6[%c0_14, %c0_15] : memref<1x128xf32, #tpu.memory_space<vmem>>, vector<1x128xf32>
    tpu.vector_store %arg6[%c0_14, %c0_15], %21 {strides = array<i32>} : memref<1x128xf32, #tpu.memory_space<vmem>>, vector<1x128xf32>,
    return
  }
  func.func @transform_0(%arg0: i32) -> (i32, i32) {
    %c0_i32 = arith.constant 0 : i32
    %c0_i32_0 = arith.constant 0 : i32
    return %c0_i32, %arg0 : i32, i32
  }
  func.func @transform_1(%arg0: i32) -> (i32, i32) {
    %c0_i32 = arith.constant 0 : i32
    %c0_i32_0 = arith.constant 0 : i32
    %c0_i32_1 = arith.constant 0 : i32
    return %c0_i32, %c0_i32_0 : i32, i32
  }
  func.func @transform_2(%arg0: i32) -> (i32, i32) {
    %c0_i32 = arith.constant 0 : i32
    %c0_i32_0 = arith.constant 0 : i32
    %c0_i32_1 = arith.constant 0 : i32
    return %c0_i32, %c0_i32_0 : i32, i32
  }
  func.func @transform_3(%arg0: i32) -> (i32, i32) {
    %c0_i32 = arith.constant 0 : i32
    %c0_i32_0 = arith.constant 0 : i32
    %c0_i32_1 = arith.constant 0 : i32
    return %c0_i32, %c0_i32_0 : i32, i32
  }
  func.func @transform_4(%arg0: i32) -> (i32, i32) {
    %c0_i32 = arith.constant 0 : i32
    %c0_i32_0 = arith.constant 0 : i32
    %c0_i32_1 = arith.constant 0 : i32
    return %c0_i32, %c0_i32_0 : i32, i32
  }
  func.func @transform_5(%arg0: i32) -> (i32, i32) {
    %c0_i32 = arith.constant 0 : i32
    %c0_i32_0 = arith.constant 0 : i32
    return %c0_i32, %arg0 : i32, i32
  }
}

</mosaic_0001>

<bundles_post_ra>
// kernel: tpu_custom_call.1
= control target key start
LH: loop header
LB: loop body
LE: loop exit
PB: predicated region body
PF: predicated region fallthrough
CT: control target
= control target key end

     0   :  { %vm344_vm0 = vcmask 1044480   ;;  %v698_v1 = vmov 0   ;;  %vm247_vm1 = vcmask 39936   ;;  %s1061_s0 = inlined_call_operand.vmem [shape: f32[5,128], index: 0, kind: input, shape index: {}]   ;;  %s1062_s1 = inlined_call_operand.vmem [shape: f32[256,5], index: 1, kind: input, shape index: {}]   ;;  %s1063_s2 = inlined_call_operand.vmem [shape: f32[256,1], index: 2, kind: input, shape index: {}]   ;;  %s1064_s3 = inlined_call_operand.vmem [shape: f32[1,256], index: 3, kind: input, shape index: {}]   ;;  %s1065_s4 = inlined_call_operand.<no memory space> [shape: f32[1,1], index: 4, kind: input, shape index: {}]   ;;  %s1066_s5 = inlined_call_operand.hbm [shape: f32[1,128], index: 5, kind: output, shape index: {}]  }
   0x1   :  { %v22_v0 = vld [vmem:[%s1061_s0] sm:$0x1f]  ;;  %666 = vset.pattern.permute.xlu1 %v698_v1  ;;  %665 = vset.pattern.permute.xlu0 %v698_v1  ;;  %v86_v2 = vld [vmem:[%s1063_s2 + $0xf8] sm:$0xff]  ;;  %v45_v6 = vld [vmem:[%s1062_s1 + $0xb0] sm:$0xff] }
   0x2   :  { %v70_v3 = vld [vmem:[%s1063_s2 + $0x78] sm:$0xff]  ;;  %627 = vmatpush.msk.msra.mxu0 %vm344_vm0, %v22_v0  ;;  %661 = vmatpush.msk.msra.mxu2 %vm344_vm0, %v22_v0  ;;  %v23_v4 = vld [vmem:[%s1062_s1] sm:$0xff]  ;;  %v69_v7 = vld [vmem:[%s1063_s2 + $0x70] sm:$0xff] }
   0x3   :  { %v38_v5 = vld [vmem:[%s1062_s1 + $0x78] sm:$0xff]  ;;  %662 = vmatpush.msk.msra.mxu3 %vm344_vm0, %v22_v0  ;;  %667 = vset.pattern.permute.xlu2 %v698_v1  ;;  %v85_v9 = vld [vmem:[%s1063_s2 + $0xf0] sm:$0xff]  ;;  %v84_v10 = vld [vmem:[%s1063_s2 + $0xe8] sm:$0xff] }
   0x4   :  { %244 = vperm.xlu0 %665, %v86_v2   ;;  %164 = vperm.xlu1 %666, %v70_v3   ;;  %v34_v8 = vld [vmem:[%s1062_s1 + $0x58] sm:$0xff]  ;;  %v24_v11 = vld [vmem:[%s1062_s1 + $0x8] sm:$0xff]  ;;  %v39_v12 = vld [vmem:[%s1062_s1 + $0x80] sm:$0xff] }
   0x5   :  { %628 = vmatmul.msk.f32.vlgmr.msra.gmra.mxu0 %vm247_vm1, %v23_v4  ;;  %643 = vmatmul.msk.f32.vlgmr.msra.gmra.mxu2 %vm247_vm1, %v38_v5  ;;  %v46_v13 = vld [vmem:[%s1062_s1 + $0xb8] sm:$0xff]  ;;  %v83_v14 = vld [vmem:[%s1063_s2 + $0xe0] sm:$0xff] }
   0x6   :  { %650 = vmatmul.msk.f32.vlgmr.msra.gmra.mxu3 %vm247_vm1, %v45_v6  ;;  %159 = vperm.xlu2 %667, %v69_v7  }
   0x7   :  { %660 = vmatpush.msk.msra.mxu1 %vm344_vm0, %v22_v0 }
   0x8   :  { %639 = vmatmul.msk.f32.vlgmr.msra.gmra.mxu1 %vm247_vm1, %v34_v8 }
   0xc   :  { %239 = vperm.xlu0 %665, %v85_v9   ;;  %234 = vperm.xlu1 %666, %v84_v10  }
   0xd   :  { %11 = vsyncpa [#allocation4], 0  ;;  %629 = vmatmul.msk.f32.gmra.mxu0 %vm247_vm1, %v24_v11  ;;  %644 = vmatmul.msk.f32.gmra.mxu2 %vm247_vm1, %v39_v12  ;;  %v35_v15 = vld [vmem:[%s1062_s1 + $0x60] sm:$0xff]  ;;  %v82_v16 = vld [vmem:[%s1063_s2 + $0xd8] sm:$0xff]  ;;  %s699_s19 = smov [#allocation3]   ;;  %s618_s23 = sshll.u32 %s1066_s5, 4  ;;  %s619_s23 = int_to_ptr.hbm [resolvable:$true] %s618_s23 }
   0xe   :  { %651 = vmatmul.msk.f32.gmra.mxu3 %vm247_vm1, %v46_v13  ;;  %229 = vperm.xlu2 %667, %v83_v14   ;;  %v68_v17 = vld [vmem:[%s1063_s2 + $0x68] sm:$0xff]  ;;  %v25_v18 = vld [vmem:[%s1062_s1 + $0x10] sm:$0xff]  ;;  %v47_v20 = vld [vmem:[%s1062_s1 + $0xc0] sm:$0xff]  ;;  %s616_s20 = sshll.u32 %s699_s19, 4  ;;  %s617_s20 = int_to_ptr.vmem [resolvable:$true] %s616_s20 }
   0xf   :  { %v40_v19 = vld [vmem:[%s1062_s1 + $0x88] sm:$0xff]  ;;  %v67_v21 = vld [vmem:[%s1063_s2 + $0x60] sm:$0xff]  ;;  %v81_v23 = vld [vmem:[%s1063_s2 + $0xd0] sm:$0xff] }
  0x10   :  { %640 = vmatmul.msk.f32.gmra.mxu1 %vm247_vm1, %v35_v15  ;;  %v36_v22 = vld [vmem:[%s1062_s1 + $0x68] sm:$0xff]  ;;  %v66_v24 = vld [vmem:[%s1063_s2 + $0x58] sm:$0xff]  ;;  %v41_v26 = vld [vmem:[%s1062_s1 + $0x90] sm:$0xff] }
  0x11   :  { %v26_v25 = vld [vmem:[%s1062_s1 + $0x18] sm:$0xff]  ;;  %v48_v27 = vld [vmem:[%s1062_s1 + $0xc8] sm:$0xff]  ;;  %v37_v29 = vld [vmem:[%s1062_s1 + $0x70] sm:$0xff] }
  0x12   :  { %v80_v28 = vld [vmem:[%s1063_s2 + $0xc8] sm:$0xff]  ;;  %v79_v30 = vld [vmem:[%s1063_s2 + $0xc0] sm:$0xff]  ;;  %v65_v31 = vld [vmem:[%s1063_s2 + $0x50] sm:$0xff] }
  0x13   :  { %v27_v32 = vld [vmem:[%s1062_s1 + $0x20] sm:$0xff]  ;;  %v42_v33 = vld [vmem:[%s1062_s1 + $0x98] sm:$0xff]  ;;  %v49_v34 = vld [vmem:[%s1062_s1 + $0xd0] sm:$0xff] }
  0x14   :  { %224 = vperm.xlu1 %666, %v82_v16   ;;  %154 = vperm.xlu0 %665, %v68_v17   ;;  %v64_v35 = vld [vmem:[%s1063_s2 + $0x48] sm:$0xff]  ;;  %v78_v36 = vld [vmem:[%s1063_s2 + $0xb8] sm:$0xff]  ;;  %v63_v37 = vld [vmem:[%s1063_s2 + $0x40] sm:$0xff] }
  0x15   :  { %630 = vmatmul.msk.f32.gmra.mxu0 %vm247_vm1, %v25_v18  ;;  %645 = vmatmul.msk.f32.gmra.mxu2 %vm247_vm1, %v40_v19  ;;  %v28_v38 = vld [vmem:[%s1062_s1 + $0x28] sm:$0xff]  ;;  %v43_v39 = vld [vmem:[%s1062_s1 + $0xa0] sm:$0xff]  ;;  %v50_v40 = vld [vmem:[%s1062_s1 + $0xd8] sm:$0xff] }
  0x16   :  { %652 = vmatmul.msk.f32.gmra.mxu3 %vm247_vm1, %v47_v20  ;;  %149 = vperm.xlu2 %667, %v67_v21   ;;  %v77_v41 = vld [vmem:[%s1063_s2 + $0xb0] sm:$0xff]  ;;  %v76_v42 = vld [vmem:[%s1063_s2 + $0xa8] sm:$0xff]  ;;  %v62_v43 = vld [vmem:[%s1063_s2 + $0x38] sm:$0xff] }
  0x17   :  { %v29_v44 = vld [vmem:[%s1062_s1 + $0x30] sm:$0xff]  ;;  %v44_v45 = vld [vmem:[%s1062_s1 + $0xa8] sm:$0xff]  ;;  %v51_v46 = vld [vmem:[%s1062_s1 + $0xe0] sm:$0xff] }
  0x18   :  { %641 = vmatmul.msk.f32.gmra.mxu1 %vm247_vm1, %v36_v22  ;;  %v61_v47 = vld [vmem:[%s1063_s2 + $0x30] sm:$0xff]  ;;  %v75_v48 = vld [vmem:[%s1063_s2 + $0xa0] sm:$0xff]  ;;  %v60_v49 = vld [vmem:[%s1063_s2 + $0x28] sm:$0xff] }
  0x19   :  { %v30_v50 = vld [vmem:[%s1062_s1 + $0x38] sm:$0xff]  ;;  %v52_v51 = vld [vmem:[%s1062_s1 + $0xe8] sm:$0xff]  ;;  %v73_v53 = vld [vmem:[%s1063_s2 + $0x90] sm:$0xff] }
  0x1a   :  { %v74_v52 = vld [vmem:[%s1063_s2 + $0x98] sm:$0xff]  ;;  %v59_v54 = vld [vmem:[%s1063_s2 + $0x20] sm:$0xff]  ;;  %v53_v56 = vld [vmem:[%s1062_s1 + $0xf0] sm:$0xff] }
  0x1b   :  { %v31_v55 = vld [vmem:[%s1062_s1 + $0x40] sm:$0xff]  ;;  %v58_v57 = vld [vmem:[%s1063_s2 + $0x18] sm:$0xff]  ;;  %v72_v58 = vld [vmem:[%s1063_s2 + $0x88] sm:$0xff] }
  0x1c   :  { %219 = vperm.xlu0 %665, %v81_v23   ;;  %144 = vperm.xlu1 %666, %v66_v24   ;;  %v57_v59 = vld [vmem:[%s1063_s2 + $0x10] sm:$0xff]  ;;  %v32_v60 = vld [vmem:[%s1062_s1 + $0x48] sm:$0xff]  ;;  %v54_v61 = vld [vmem:[%s1062_s1 + $0xf8] sm:$0xff] }
  0x1d   :  { %631 = vmatmul.msk.f32.gmra.mxu0 %vm247_vm1, %v26_v25  ;;  %646 = vmatmul.msk.f32.gmra.mxu2 %vm247_vm1, %v41_v26  ;;  %v71_v62 = vld [vmem:[%s1063_s2 + $0x80] sm:$0xff]  ;;  %v56_v63 = vld [vmem:[%s1063_s2 + $0x8] sm:$0xff]  ;;  %v33_v1 = vld [vmem:[%s1062_s1 + $0x50] sm:$0xff] }
  0x1e   :  { %653 = vmatmul.msk.f32.gmra.mxu3 %vm247_vm1, %v48_v27  ;;  %214 = vperm.xlu2 %667, %v80_v28   ;;  %v55_v0 = vld [vmem:[%s1063_s2] sm:$0xff] }
  0x20   :  { %642 = vmatmul.msk.f32.gmra.mxu1 %vm247_vm1, %v37_v29 }
  0x24   :  { %209 = vperm.xlu1 %666, %v79_v30   ;;  %139 = vperm.xlu0 %665, %v65_v31  }
  0x25   :  { %632 = vmatmul.msk.f32.gmra.mxu0 %vm247_vm1, %v27_v32  ;;  %647 = vmatmul.msk.f32.gmra.mxu2 %vm247_vm1, %v42_v33 }
  0x26   :  { %654 = vmatmul.msk.f32.gmra.mxu3 %vm247_vm1, %v49_v34  ;;  %134 = vperm.xlu2 %667, %v64_v35  }
  0x2c   :  { %204 = vperm.xlu0 %665, %v78_v36   ;;  %129 = vperm.xlu1 %666, %v63_v37  }
  0x2d   :  { %633 = vmatmul.msk.f32.gmra.mxu0 %vm247_vm1, %v28_v38  ;;  %648 = vmatmul.msk.f32.gmra.mxu2 %vm247_vm1, %v43_v39 }
  0x2e   :  { %655 = vmatmul.msk.f32.gmra.mxu3 %vm247_vm1, %v50_v40  ;;  %199 = vperm.xlu2 %667, %v77_v41  }
  0x34   :  { %194 = vperm.xlu1 %666, %v76_v42   ;;  %124 = vperm.xlu0 %665, %v62_v43  }
  0x35   :  { %634 = vmatmul.msk.f32.gmra.mxu0 %vm247_vm1, %v29_v44  ;;  %649 = vmatmul.msk.f32.gmra.mxu2 %vm247_vm1, %v44_v45 }
  0x36   :  { %656 = vmatmul.msk.f32.gmra.mxu3 %vm247_vm1, %v51_v46  ;;  %119 = vperm.xlu2 %667, %v61_v47  }
  0x3c   :  { %189 = vperm.xlu0 %665, %v75_v48   ;;  %114 = vperm.xlu1 %666, %v60_v49  }
  0x3d   :  { %635 = vmatmul.msk.f32.gmra.mxu0 %vm247_vm1, %v30_v50 }
  0x3e   :  { %657 = vmatmul.msk.f32.gmra.mxu3 %vm247_vm1, %v52_v51  ;;  %184 = vperm.xlu2 %667, %v74_v52  }
  0x44   :  { %179 = vperm.xlu1 %666, %v73_v53   ;;  %109 = vperm.xlu0 %665, %v59_v54  }
  0x45   :  { %636 = vmatmul.msk.f32.gmra.mxu0 %vm247_vm1, %v31_v55 }
  0x46   :  { %658 = vmatmul.msk.f32.gmra.mxu3 %vm247_vm1, %v53_v56  ;;  %104 = vperm.xlu2 %667, %v58_v57  }
  0x4c   :  { %174 = vperm.xlu0 %665, %v72_v58   ;;  %99 = vperm.xlu1 %666, %v57_v59  }
  0x4d   :  { %637 = vmatmul.msk.f32.gmra.mxu0 %vm247_vm1, %v32_v60 }
  0x4e   :  { %659 = vmatmul.msk.f32.gmra.mxu3 %vm247_vm1, %v54_v61  ;;  %169 = vperm.xlu2 %667, %v71_v62  }
  0x54   :  { %94 = vperm.xlu0 %665, %v56_v63   ;;  %89 = vperm.xlu1 %666, %v55_v0  }
  0x55   :  { %638 = vmatmul.msk.f32.gmra.mxu0 %vm247_vm1, %v33_v1 }
  0x60   :  { %v160_v8 = vpop.permute.xlu2 %159 }
  0x68   :  { %v975_v18 = vpop.permute.xlu2 %229 }
  0x70   :  { %v150_v27 = vpop.permute.xlu2 %149 }
  0x76   :  { %v961_v2 = vpop.permute.xlu0 %244  ;;  %v165_v3 = vpop.permute.xlu1 %164 }
  0x78   :  { %v993_v45 = vpop.permute.xlu2 %214 }
  0x7e   :  { %v965_v5 = vpop.permute.xlu0 %239  ;;  %v967_v7 = vpop.permute.xlu1 %234 }
  0x80   :  { %v135_v52 = vpop.permute.xlu2 %134 }
  0x82   :  { %v963_v4 = vpop.f32.mrf.mxu0 }
  0x85   :  { %v398_v6 = vpop.f32.mrf.mxu1 }
  0x86   :  { %v155_v16 = vpop.permute.xlu0 %154  ;;  %v973_v17 = vpop.permute.xlu1 %224 }
  0x88   :  { %v410_v9 = vpop.f32.mrf.mxu2  ;;  %v1003_v58 = vpop.permute.xlu2 %199 }
  0x89   :  { %v411_v10 = vadd.f32 %v410_v9, %v165_v3  ;;  %v969_v11 = vpop.f32.mrf.mxu3 }
  0x8a   :  { %v971_v12 = vpop.f32.mrf.mxu0 }
  0x8b   :  { %vm476_vm2 = vcmp.gt.f32.partialorder %v411_v10, 0.0  ;;  %v508_v13 = vmul.f32 0.1, %v411_v10 }
  0x8d   :  { %v401_v14 = vpop.f32.mrf.mxu1  ;;  %v540_v15 = vsel %vm476_vm2, %v411_v10, %v508_v13 }
  0x8e   :  { %565 = vmatpush.msrb.mxu1 %v540_v15  ;;  %v981_v22 = vpop.permute.xlu0 %219  ;;  %v145_v24 = vpop.permute.xlu1 %144  ;;  %v402_v28 = vadd.f32 %v401_v14, %v150_v27 }
  0x8f   :  { %v399_v30 = vadd.f32 %v398_v6, %v145_v24 }
  0x90   :  { %v505_v34 = vmul.f32 0.1, %v402_v28  ;;  %vm473_vm5 = vcmp.gt.f32.partialorder %v402_v28, 0.0  ;;  %v997_v48 = vpop.f32.mrf.mxu2  ;;  %v120_v0 = vpop.permute.xlu2 %119 }
  0x91   :  { %v977_v19 = vpop.f32.mrf.mxu3  ;;  %v504_v40 = vmul.f32 0.1, %v399_v30  ;;  %vm472_vm6 = vcmp.gt.f32.partialorder %v399_v30, 0.0 }
  0x92   :  { %v979_v20 = vpop.f32.mrf.mxu0  ;;  %v537_v42 = vsel %vm473_vm5, %v402_v28, %v505_v34 }
  0x93   :  { %v536_v43 = vsel %vm472_vm6, %v399_v30, %v504_v40 }
  0x95   :  { %v404_v21 = vpop.f32.mrf.mxu1 }
  0x96   :  { %v405_v26 = vadd.f32 %v404_v21, %v155_v16  ;;  %v140_v36 = vpop.permute.xlu0 %139  ;;  %v991_v41 = vpop.permute.xlu1 %209 }
  0x98   :  { %v506_v32 = vmul.f32 0.1, %v405_v26  ;;  %vm474_vm3 = vcmp.gt.f32.partialorder %v405_v26, 0.0  ;;  %v999_v54 = vpop.f32.mrf.mxu2  ;;  %v1014_v15 = vpop.permute.xlu2 %184 }
  0x99   :  { %v983_v23 = vpop.f32.mrf.mxu3 }
  0x9a   :  { %v985_v25 = vpop.f32.mrf.mxu0  ;;  %v538_v39 = vsel %vm474_vm3, %v405_v26, %v506_v32 }
  0x9d   :  { %v407_v29 = vpop.f32.mrf.mxu1 }
  0x9e   :  { %v408_v31 = vadd.f32 %v407_v29, %v160_v8  ;;  %v995_v47 = vpop.permute.xlu0 %204  ;;  %v130_v49 = vpop.permute.xlu1 %129 }
  0xa0   :  { %vm475_vm4 = vcmp.gt.f32.partialorder %v408_v31, 0.0  ;;  %v507_v33 = vmul.f32 0.1, %v408_v31  ;;  %v1007_v60 = vpop.f32.mrf.mxu2 }
  0xa1   :  { %v987_v35 = vpop.f32.mrf.mxu3 }
  0xa2   :  { %v989_v37 = vpop.f32.mrf.mxu0  ;;  %v539_v38 = vsel %vm475_vm4, %v408_v31, %v507_v33 }
  0xa3   :  { %566 = vmatpush.msrb.mxu1 %v539_v38 }
  0xa5   :  { %567 = vmatpush.msrb.mxu1 %v538_v39 }
  0xa6   :  { %v125_v53 = vpop.permute.xlu0 %124  ;;  %v1001_v55 = vpop.permute.xlu1 %194 }
  0xa7   :  { %568 = vmatpush.msrb.mxu1 %v537_v42 }
  0xa8   :  { %v1009_v8 = vpop.f32.mrf.mxu2 }
  0xa9   :  { %v443_v44 = vpop.f32.mrf.mxu3  ;;  %569 = vmatpush.msrb.mxu1 %v536_v43 }
  0xaa   :  { %v380_v46 = vpop.f32.mrf.mxu0  ;;  %v444_v42 = vadd.f32 %v443_v44, %v981_v22 }
  0xac   :  { %vm487_vm1 = vcmp.gt.f32.partialorder %v444_v42, 0.0 }
  0xae   :  { %v1005_v59 = vpop.permute.xlu0 %189  ;;  %v115_v62 = vpop.permute.xlu1 %114 }
  0xb1   :  { %v446_v50 = vpop.f32.mrf.mxu3 }
  0xb2   :  { %v383_v51 = vpop.f32.mrf.mxu0 }
  0xb3   :  { %v384_v39 = vadd.f32 %v383_v51, %v120_v0 }
  0xb5   :  { %v499_v44 = vmul.f32 0.1, %v384_v39  ;;  %vm467_vm0 = vcmp.gt.f32.partialorder %v384_v39, 0.0 }
  0xb6   :  { %v110_v3 = vpop.permute.xlu0 %109  ;;  %v1011_v9 = vpop.permute.xlu1 %179 }
  0xb9   :  { %v449_v56 = vpop.f32.mrf.mxu3 }
  0xba   :  { %v386_v57 = vpop.f32.mrf.mxu0  ;;  %v450_v26 = vadd.f32 %v449_v56, %v975_v18 }
  0xbb   :  { %v387_v29 = vadd.f32 %v386_v57, %v125_v53  ;;  %v378_v57 = vadd.f32 %v989_v37, %v110_v3  ;;  %v435_v37 = vadd.f32 %v977_v19, %v995_v47 }
  0xbc   :  { %vm489_vm13 = vcmp.gt.f32.partialorder %v450_v26, 0.0 }
  0xbd   :  { %vm468_vm14 = vcmp.gt.f32.partialorder %v387_v29, 0.0  ;;  %vm465_vm4 = vcmp.gt.f32.partialorder %v378_v57, 0.0 }
  0xbe   :  { %v1019_v30 = vpop.permute.xlu0 %174 }
  0xc1   :  { %v452_v61 = vpop.f32.mrf.mxu3 }
  0xc2   :  { %v389_v63 = vpop.f32.mrf.mxu0  ;;  %v453_v16 = vadd.f32 %v452_v61, %v967_v7  ;;  %v447_v7 = vadd.f32 %v446_v50, %v973_v17  ;;  %v500_v17 = vmul.f32 0.1, %v387_v29  ;;  %v441_v50 = vadd.f32 %v987_v35, %v993_v45  ;;  %v105_v61 = vpop.permute.xlu2 %104 }
  0xc3   :  { %v390_v27 = vadd.f32 %v389_v63, %v130_v49  ;;  %v521_v49 = vmul.f32 0.1, %v450_v26  ;;  %v519_v63 = vmul.f32 0.1, %v444_v42  ;;  %v375_v35 = vadd.f32 %v985_v25, %v105_v61 }
  0xc4   :  { %v522_v18 = vmul.f32 0.1, %v453_v16  ;;  %vm490_vm11 = vcmp.gt.f32.partialorder %v453_v16, 0.0  ;;  %v520_v56 = vmul.f32 0.1, %v447_v7  ;;  %vm488_vm15 = vcmp.gt.f32.partialorder %v447_v7, 0.0 }
  0xc5   :  { %v501_v40 = vmul.f32 0.1, %v390_v27  ;;  %vm469_vm12 = vcmp.gt.f32.partialorder %v390_v27, 0.0  ;;  %v532_v45 = vsel %vm468_vm14, %v387_v29, %v500_v17  ;;  %vm486_vm3 = vcmp.gt.f32.partialorder %v441_v50, 0.0 }
  0xc6   :  { %v554_v51 = vsel %vm490_vm11, %v453_v16, %v522_v18  ;;  %v552_v3 = vsel %vm488_vm15, %v447_v7, %v520_v56  ;;  %v497_v25 = vmul.f32 0.1, %v378_v57  ;;  %v551_v19 = vsel %vm487_vm1, %v444_v42, %v519_v63  ;;  %v557_v18 = vld [vmem:[%s1064_s3] sm:$0x3] }
  0xc7   :  { %v533_v22 = vsel %vm469_vm12, %v390_v27, %v501_v40  ;;  %vm464_vm6 = vcmp.gt.f32.partialorder %v375_v35, 0.0  ;;  %v516_v27 = vmul.f32 0.1, %v435_v37 }
  0xc9   :  { %v455_v1 = vpop.f32.mrf.mxu3 }
  0xca   :  { %v392_v6 = vpop.f32.mrf.mxu0  ;;  %v456_v10 = vadd.f32 %v455_v1, %v965_v5  ;;  %v1021_v5 = vpop.f32.mrf.mxu2 }
  0xcb   :  { %v393_v13 = vadd.f32 %v392_v6, %v135_v52  ;;  %v381_v52 = vadd.f32 %v380_v46, %v115_v62  ;;  %v438_v46 = vadd.f32 %v983_v23, %v991_v41  ;;  %v553_v62 = vsel %vm489_vm13, %v450_v26, %v521_v49  ;;  %v95_v1 = vpop.permute.xlu0 %94 }
  0xcc   :  { %v523_v32 = vmul.f32 0.1, %v456_v10  ;;  %vm491_vm9 = vcmp.gt.f32.partialorder %v456_v10, 0.0  ;;  %v518_v23 = vmul.f32 0.1, %v441_v50  ;;  %v369_v16 = vadd.f32 %v971_v12, %v95_v1 }
  0xcd   :  { %v502_v34 = vmul.f32 0.1, %v393_v13  ;;  %vm470_vm10 = vcmp.gt.f32.partialorder %v393_v13, 0.0  ;;  %v498_v0 = vmul.f32 0.1, %v381_v52  ;;  %vm466_vm2 = vcmp.gt.f32.partialorder %v381_v52, 0.0 }
  0xce   :  { %v555_v43 = vsel %vm491_vm9, %v456_v10, %v523_v32  ;;  %v531_v10 = vsel %vm467_vm0, %v384_v39, %v499_v44  ;;  %v517_v47 = vmul.f32 0.1, %v438_v46  ;;  %vm485_vm5 = vcmp.gt.f32.partialorder %v438_v46, 0.0 }
  0xcf   :  { %v534_v53 = vsel %vm470_vm10, %v393_v13, %v502_v34  ;;  %v432_v13 = vadd.f32 %v969_v11, %v1003_v58  ;;  %v550_v26 = vsel %vm486_vm3, %v441_v50, %v518_v23  ;;  %v529_v58 = vsel %vm465_vm4, %v378_v57, %v497_v25 }
  0xd0   :  { %v426_v12 = vadd.f32 %v1021_v5, %v1005_v59  ;;  %v549_v29 = vsel %vm485_vm5, %v438_v46, %v517_v47  ;;  %vm462_vm10 = vcmp.gt.f32.partialorder %v369_v16, 0.0  ;;  %v420_v59 = vadd.f32 %v1007_v60, %v1011_v9 }
  0xd1   :  { %v458_v14 = vpop.f32.mrf.mxu3  ;;  %vm483_vm9 = vcmp.gt.f32.partialorder %v432_v13, 0.0  ;;  %v561_v39 = vperm.slane %v557_v18, 0  ;;  %v562_v50 = vperm.slane %v557_v18, 1 }
  0xd2   :  { %v459_v21 = vadd.f32 %v458_v14, %v961_v2  ;;  %v395_v24 = vpop.f32.mrf.mxu0  ;;  %v100_v2 = vpop.permute.xlu1 %99  ;;  %vm481_vm13 = vcmp.gt.f32.partialorder %v426_v12, 0.0  ;;  %v511_v49 = vmul.f32 0.1, %v420_v59  ;;  %vm479_vm15 = vcmp.gt.f32.partialorder %v420_v59, 0.0 }
  0xd3   :  { %v396_v28 = vadd.f32 %v395_v24, %v140_v36  ;;  %v428_v41 = vpop.f32.mrf.mxu2  ;;  %v372_v6 = vadd.f32 %v979_v20, %v100_v2  ;;  %v496_v20 = vmul.f32 0.1, %v375_v35 }
  0xd4   :  { %vm492_vm7 = vcmp.gt.f32.partialorder %v459_v21, 0.0  ;;  %v524_v31 = vmul.f32 0.1, %v459_v21  ;;  %v429_v24 = vadd.f32 %v428_v41, %v1001_v55  ;;  %v494_v55 = vmul.f32 0.1, %v369_v16 }
  0xd5   :  { %vm471_vm8 = vcmp.gt.f32.partialorder %v396_v28, 0.0  ;;  %v503_v33 = vmul.f32 0.1, %v396_v28  ;;  %v528_v32 = vsel %vm464_vm6, %v375_v35, %v496_v20  ;;  %v543_v17 = vsel %vm479_vm15, %v420_v59, %v511_v49 }
  0xd6   :  { %v556_v38 = vsel %vm492_vm7, %v459_v21, %v524_v31  ;;  %v530_v21 = vsel %vm466_vm2, %v381_v52, %v498_v0  ;;  %vm484_vm7 = vcmp.gt.f32.partialorder %v435_v37, 0.0  ;;  %v515_v31 = vmul.f32 0.1, %v432_v13 }
  0xd7   :  { %585 = vmatpush.msrb.mxu2 %v556_v38  ;;  %v535_v36 = vsel %vm471_vm8, %v396_v28, %v503_v33  ;;  %v495_v28 = vmul.f32 0.1, %v372_v6  ;;  %vm463_vm8 = vcmp.gt.f32.partialorder %v372_v6, 0.0  ;;  %v423_v33 = vadd.f32 %v1009_v8, %v1014_v15  ;;  %v170_v8 = vpop.permute.xlu2 %169 }
  0xd8   :  { %570 = vmatpush.msrb.mxu1 %v535_v36  ;;  %v514_v34 = vmul.f32 0.1, %v429_v24  ;;  %vm482_vm11 = vcmp.gt.f32.partialorder %v429_v24, 0.0  ;;  %v547_v5 = vsel %vm483_vm9, %v432_v13, %v515_v31  ;;  %v513_v38 = vmul.f32 0.1, %v426_v12 }
  0xd9   :  { %586 = vmatpush.msrb.mxu2 %v555_v43  ;;  %v527_v7 = vsel %vm463_vm8, %v372_v6, %v495_v28  ;;  %v526_v15 = vsel %vm462_vm10, %v369_v16, %v494_v55  ;;  %v417_v36 = vadd.f32 %v999_v54, %v1019_v30  ;;  %v512_v42 = vmul.f32 0.1, %v423_v33 }
  0xda   :  { %571 = vmatpush.msrb.mxu1 %v534_v53  ;;  %v90_v14 = vpop.permute.xlu1 %89  ;;  %v546_v40 = vsel %vm482_vm11, %v429_v24, %v514_v34  ;;  %vm480_vm14 = vcmp.gt.f32.partialorder %v423_v33, 0.0  ;;  %v414_v9 = vadd.f32 %v997_v48, %v170_v8  ;;  %v545_v43 = vsel %vm481_vm13, %v426_v12, %v513_v38 }
  0xdb   :  { %587 = vmatpush.msrb.mxu2 %v554_v51  ;;  %v366_v11 = vadd.f32 %v963_v4, %v90_v14  ;;  %v548_v4 = vsel %vm484_vm7, %v435_v37, %v516_v27  ;;  %v544_v52 = vsel %vm480_vm14, %v423_v33, %v512_v42  ;;  %v510_v53 = vmul.f32 0.1, %v417_v36 }
  0xdc   :  { %572 = vmatpush.msrb.mxu1 %v533_v22  ;;  %vm478_vm0 = vcmp.gt.f32.partialorder %v417_v36, 0.0  ;;  %v509_v54 = vmul.f32 0.1, %v414_v9  ;;  %vm477_vm1 = vcmp.gt.f32.partialorder %v414_v9, 0.0  ;;  %v559_v48 = vstv %s1065_s4 }
  0xdd   :  { %588 = vmatpush.msrb.mxu2 %v553_v62  ;;  %v493_v2 = vmul.f32 0.1, %v366_v11  ;;  %vm461_vm12 = vcmp.gt.f32.partialorder %v366_v11, 0.0  ;;  %v542_v30 = vsel %vm478_vm0, %v417_v36, %v510_v53 }
  0xde   :  { %573 = vmatpush.msrb.mxu1 %v532_v45  ;;  %v541_v51 = vsel %vm477_vm1, %v414_v9, %v509_v54 }
  0xdf   :  { %589 = vmatpush.msrb.mxu2 %v552_v3  ;;  %v525_v60 = vsel %vm461_vm12, %v366_v11, %v493_v2 }
  0xe0   :  { %574 = vmatpush.msrb.mxu1 %v531_v10 }
  0xe1   :  { %590 = vmatpush.msrb.mxu2 %v551_v19 }
  0xe2   :  { %575 = vmatpush.msrb.mxu1 %v530_v21 }
  0xe3   :  { %591 = vmatpush.msrb.mxu2 %v550_v26 }
  0xe4   :  { %576 = vmatpush.msrb.mxu1 %v529_v58 }
  0xe5   :  { %592 = vmatpush.msrb.mxu2 %v549_v29 }
  0xe6   :  { %577 = vmatpush.msrb.mxu1 %v528_v32 }
  0xe7   :  { %593 = vmatpush.msrb.mxu2 %v548_v4 }
  0xe8   :  { %578 = vmatpush.msrb.mxu1 %v527_v7 }
  0xe9   :  { %594 = vmatpush.msrb.mxu2 %v547_v5 }
  0xea   :  { %579 = vmatpush.msrb.mxu1 %v526_v15 }
  0xeb   :  { %595 = vmatpush.msrb.mxu2 %v546_v40 }
  0xec   :  { %580 = vmatpush.msrb.mxu1 %v525_v60 }
  0xed   :  { %596 = vmatpush.msrb.mxu2 %v545_v43  ;;  %581 = vmatmul.f32.vlgmr.msrb.gmra.mxu1 %v561_v39 }
  0xef   :  { %597 = vmatpush.msrb.mxu2 %v544_v52 }
  0xf1   :  { %598 = vmatpush.msrb.mxu2 %v543_v17 }
  0xf3   :  { %599 = vmatpush.msrb.mxu2 %v542_v30 }
  0xf5   :  { %600 = vmatpush.msrb.mxu2 %v541_v51 }
  0xf6   :  { %601 = vmatmul.f32.vlgmr.msrb.gmra.mxu2 %v562_v50 }
 0x16a   :  { %v582_v56 = vpop.f32.mrf.mxu1 }
 0x16b   :  { %v583_v57 = vadd.f32 %v582_v56, %v559_v48 }
 0x179   :  { %v602_v22 = vpop.f32.mrf.mxu2 }
 0x17a   :  { %v603_v44 = vadd.f32 %v602_v22, %v583_v57 }
 0x17c   :  { %v605_v46 = vsub.f32 0.0, %v603_v44 }
 0x17e   :  { %v606_v61 = vmul.f32 1.442695, %v605_v46 }
 0x180   :  { %668 = vpow2.f32 %v606_v61 }
 0x186   :  { %v669_v62 = vpop.eup %668 }
 0x187   :  { %v608_v63 = vadd.f32 1.0, %v669_v62 }
 0x189   :  { %670 = vrcp.f32 %v608_v63 }
 0x18f   :  { %v671_v35 = vpop.eup %670 }
 0x190   :  { %610 = vst [vmem:[#allocation3] sm:$0x1] %v671_v35 }
 0x191   :  { %621 = dma.vmem_to_hbm [thread:$0]  %s617_s20, 16, %s619_s23, [#allocation4]  }
 0x192   :  { %696 = dma.done.wait [#allocation4], 16  }
 0x193   :  { %697 = vsyncadd [#allocation4], 4294967280 }
 0x194   :  { %626 = vsyncpa [#allocation4], 1 }

</bundles_post_ra>
